<compile_context>
chip_gen: v7x
topology: tpu7x:2x2x1
jax: 0.10.0
libtpu: 0.0.40
codegen_flags: <defaults>
</compile_context>

<pallas_src>
import functools
import math

import jax
import jax.numpy as jnp
from jax import lax
from jax.experimental import pallas as pl
from jax.experimental.pallas import tpu as pltpu


# ---------------------------------------------------------------------------
# Pallas kernel: one batch tile -> one partial-sum vreg (no cross-step state)
# ---------------------------------------------------------------------------
def _mf_loss_kernel(u_ref, p_ref, n_ref, out_ref, *,
                    inv_temp, loss_type, batch_size, neg_chunk):
    tb, dim = u_ref.shape
    u = u_ref[...].astype(jnp.float32)                        # (tb, dim)
    p = p_ref[...].astype(jnp.float32)                        # (tb, dim)
    s_pos = jnp.sum(u * p, axis=-1, keepdims=True)            # (tb, 1)

    if loss_type == "BPR":
        n = n_ref[...].astype(jnp.float32)                    # (tb, dim)
        s_neg = jnp.sum(u * n, axis=-1, keepdims=True)        # (tb, 1)
        # -log(e^a / (e^a + e^b)) = softplus(b - a), a = s_pos/T, b = s_neg/T
        x = (s_neg - s_pos) * inv_temp
        loss = jnp.maximum(x, 0.0) + jnp.log(1.0 + jnp.exp(-jnp.abs(x)))
    else:  # Info_NCE: -log(e^a / (e^a + sum_j e^{b_j})) = logsumexp({0, b_j-a})
        n_neg = n_ref.shape[1]
        # Running logsumexp, initialised with the "0" term (the positive).
        m = jnp.zeros((tb, 1), jnp.float32)                   # running max
        s = jnp.ones((tb, 1), jnp.float32)                    # running sum exp
        # Fully-unrolled static chunk loop (static trip count, static slices)
        # keeps the f32 intermediate at (tb, chunk, dim), not (tb, N, dim).
        for c0 in range(0, n_neg, neg_chunk):
            c1 = min(c0 + neg_chunk, n_neg)
            nc = n_ref[:, c0:c1, :].astype(jnp.float32)       # (tb, ck, dim)
            d = (jnp.sum(u[:, None, :] * nc, axis=-1) - s_pos) * inv_temp
            m_new = jnp.maximum(m, jnp.max(d, axis=-1, keepdims=True))
            s = s * jnp.exp(m - m_new) + jnp.sum(jnp.exp(d - m_new), axis=-1,
                                                 keepdims=True)
            m = m_new
        loss = m + jnp.log(s)                                 # (tb, 1)

    # Mask rows of a (possibly) padded final tile, reduce to one partial sum,
    # and write it as a single dense (8,128) vreg (host reads out[:, 0, 0]).
    row0 = pl.program_id(0) * tb
    rows = lax.broadcasted_iota(jnp.int32, (tb, 1), 0) + row0
    loss = jnp.where(rows < batch_size, loss, 0.0)
    tile_sum = jnp.sum(loss)
    out_ref[...] = jnp.full(out_ref.shape, tile_sum, jnp.float32)


# ---------------------------------------------------------------------------
# Generation-aware tile / VMEM-limit selection
# ---------------------------------------------------------------------------
def _choose_tiling(bs, dim, n_rows, in_itemsize, neg_chunk, max_tile_b=None):
    """Pick (tile_b, vmem_limit_bytes) from the device's VMEM capacity and an
    honest per-row working-set estimate."""
    try:
        vmem_cap = pltpu.get_tpu_info().vmem_capacity_bytes
    except Exception:  # not queryable: assume the smallest part (v7x, 64 MiB)
        vmem_cap = 64 * 1024 * 1024

    if vmem_cap >= 100 * 1024 * 1024:          # v5e / v6e: 128 MiB physical
        vmem_limit = 96 * 1024 * 1024
        budget = 64 * 1024 * 1024
        force_two_steps = False
    else:                                      # v7x: 64 MiB physical, 2 TCs
        vmem_limit = 30 * 1024 * 1024
        budget = 20 * 1024 * 1024
        force_two_steps = True

    ck = min(neg_chunk, n_rows)
    per_row = (
        2 * (2 + n_rows) * dim * in_itemsize   # double-buffered bf16 inputs
        + (4 + 2 * ck) * dim * 4               # f32 upcasts + products (u,p,chunk)
        + (n_rows + 16) * 4                    # scores / running stats / loss
    )
    tile_b = max(16, (budget // per_row) // 16 * 16)

    if force_two_steps and bs >= 32:
        # guarantee >= 2 grid steps so both v7x TensorCores get work
        half = -(-bs // 2)
        tile_b = min(tile_b, -(-half // 16) * 16)
    if max_tile_b is not None:
        tile_b = min(tile_b, max(16, (max_tile_b // 16) * 16))
    if tile_b >= bs:
        tile_b = bs                            # single full-extent block
    return tile_b, vmem_limit


# ---------------------------------------------------------------------------
# Wrapper: per-tile partial sums -> mean loss
# ---------------------------------------------------------------------------
def mf_forward_loss(users_emb, pos_emb, neg_emb, *, temperature, loss_type,
                    max_tile_b=None):
    """MF loss from already-gathered embeddings.

    users_emb: (bs, dim); pos_emb: (bs, dim)  (positive column 0 only);
    neg_emb:   (bs, dim) for BPR, (bs, N, dim) for Info_NCE.
    """
    if loss_type not in ("BPR", "Info_NCE"):
        raise ValueError("Invalid loss function [BPR, Info_NCE]")
    bs, dim = users_emb.shape
    n_rows = 1 if neg_emb.ndim == 2 else neg_emb.shape[1]
    neg_chunk = 16                              # negatives per in-kernel chunk

    itemsize = max(jnp.dtype(users_emb.dtype).itemsize,
                   jnp.dtype(pos_emb.dtype).itemsize,
                   jnp.dtype(neg_emb.dtype).itemsize)
    tile_b, vmem_limit = _choose_tiling(bs, dim, n_rows, itemsize, neg_chunk,
                                        max_tile_b=max_tile_b)
    num_tiles = -(-bs // tile_b)

    if neg_emb.ndim == 2:
        neg_spec = pl.BlockSpec((tile_b, dim), lambda i: (i, 0))
    else:
        neg_spec = pl.BlockSpec((tile_b, n_rows, dim), lambda i: (i, 0, 0))

    kernel = functools.partial(
        _mf_loss_kernel,
        inv_temp=float(1.0 / temperature),
        loss_type=loss_type,
        batch_size=bs,
        neg_chunk=neg_chunk,
    )

    partials = pl.pallas_call(
        kernel,
        out_shape=jax.ShapeDtypeStruct((num_tiles, 8, 128), jnp.float32),
        grid_spec=pltpu.PrefetchScalarGridSpec(
            num_scalar_prefetch=0,
            grid=(num_tiles,),
            in_specs=[
                pl.BlockSpec((tile_b, dim), lambda i: (i, 0)),   # users
                pl.BlockSpec((tile_b, dim), lambda i: (i, 0)),   # positive col 0
                neg_spec,                                        # negatives
            ],
            out_specs=pl.BlockSpec((1, 8, 128), lambda i: (i, 0, 0)),
        ),
        compiler_params=pltpu.CompilerParams(
            dimension_semantics=("parallel",),   # independent tiles -> megacore
            vmem_limit_bytes=vmem_limit,
        ),
    )(users_emb, pos_emb, neg_emb)

    return jnp.sum(partials[:, 0, 0]) / bs


# ---------------------------------------------------------------------------
# MF module (parameter setup + gather glue in plain JAX)
# ---------------------------------------------------------------------------
class MF:
    def __init__(self, num_users, num_items, dim, temperature, loss_type, key,
                 param_dtype=jnp.bfloat16):
        self.num_users = num_users
        self.num_items = num_items
        self.dim = dim
        self.temperature = temperature
        self.loss_type = loss_type
        k_u, k_i = jax.random.split(key)
        # nn.init.xavier_normal_: std = sqrt(2 / (fan_in + fan_out))
        std_u = math.sqrt(2.0 / (num_users + dim))
        std_i = math.sqrt(2.0 / (num_items + dim))
        self.user_emb = (std_u * jax.random.normal(
            k_u, (num_users, dim), jnp.float32)).astype(param_dtype)
        self.item_emb = (std_i * jax.random.normal(
            k_i, (num_items, dim), jnp.float32)).astype(param_dtype)

    def forward(self, users, positives, negatives, epoch=0, max_tile_b=None):
        # Gather only what the loss reads (pure indexing glue; see TODO above
        # about fusing this gather into the kernel once dim >= 128).
        users_emb = self.user_emb[users]                       # (bs, dim)
        pos_emb = self.item_emb[positives[:, 0]]               # (bs, dim)
        if self.loss_type == "BPR":
            neg_emb = self.item_emb[negatives[:, 0]]           # (bs, dim)
        else:  # Info_NCE needs every negative
            neg_emb = self.item_emb[negatives]                 # (bs, N, dim)
        return mf_forward_loss(
            users_emb, pos_emb, neg_emb,
            temperature=self.temperature, loss_type=self.loss_type,
            max_tile_b=max_tile_b)

    # reference implementation (plain JAX, original exp/div/log form)
    def forward_ref(self, users, positives, negatives, epoch=0):
        users_emb = self.user_emb[users].astype(jnp.float32)
        pos_item_embs = self.item_emb[positives].astype(jnp.float32)
        neg_item_embs = self.item_emb[negatives].astype(jnp.float32)
        pos_scores = jnp.exp(jnp.sum(users_emb[:, None, :] * pos_item_embs, -1)
                             / self.temperature)
        neg_scores = jnp.exp(jnp.sum(users_emb[:, None, :] * neg_item_embs, -1)
                             / self.temperature)
        if self.loss_type == "BPR":
            denom = pos_scores[:, 0] + neg_scores[:, 0]
        else:
            denom = pos_scores[:, 0] + jnp.sum(neg_scores, axis=-1)
        return jnp.mean(-jnp.log(pos_scores[:, 0] / denom))


if __name__ == "__main__":
    key = jax.random.PRNGKey(0)
    k_model, k_u, k_p, k_n = jax.random.split(key, 4)

    num_users, num_items, dim = 32, 64, 32
    temperature = 0.2

    # --- small demo config (single tile) ---
    bs, M, N = 8, 4, 6
    users = jax.random.randint(k_u, (bs,), 0, num_users)
    positives = jax.random.randint(k_p, (bs, M), 0, num_items)
    negatives = jax.random.randint(k_n, (bs, N), 0, num_items)

    for lt in ("BPR", "Info_NCE"):
        model = MF(num_users, num_items, dim, temperature, loss_type=lt,
                   key=k_model)
        loss = model.forward(users, positives, negatives, epoch=0)
        jax.block_until_ready(loss)
        loss_ref = model.forward_ref(users, positives, negatives, epoch=0)
        assert jnp.allclose(loss, loss_ref, rtol=5e-5, atol=1e-6), \
            (lt, loss, loss_ref)

    # --- multi-tile / ragged-batch / chunked-negatives path (tile_b = 16) ---
    bs2, M2, N2 = 40, 4, 40
    users2 = jax.random.randint(k_u, (bs2,), 0, num_users)
    positives2 = jax.random.randint(k_p, (bs2, M2), 0, num_items)
    negatives2 = jax.random.randint(k_n, (bs2, N2), 0, num_items)

    for lt in ("BPR", "Info_NCE"):
        model = MF(num_users, num_items, dim, temperature, loss_type=lt,
                   key=k_model)
        loss = model.forward(users2, positives2, negatives2, epoch=0,
                             max_tile_b=16)
        jax.block_until_ready(loss)
        loss_ref = model.forward_ref(users2, positives2, negatives2, epoch=0)
        assert jnp.allclose(loss, loss_ref, rtol=5e-5, atol=1e-6), \
            (lt, loss, loss_ref)

    print("KERNEL_OK")
</pallas_src>

<mosaic_0001>
module attributes {stable_mosaic.version = 11 : i64} {
  func.func @_mf_loss_kernel(%arg0: i32, %arg1: memref<8x32xbf16, #tpu.memory_space<vmem>>, %arg2: memref<8x32xbf16, #tpu.memory_space<vmem>>, %arg3: memref<8x32xbf16, #tpu.memory_space<vmem>>, %arg4: memref<1x8x128xf32, #tpu.memory_space<vmem>>) attributes {dimension_semantics = [#tpu.dimension_semantics<parallel>], iteration_bounds = array<i64: 1>, scalar_prefetch = 0 : i64, scratch_operands = 0 : i64, tpu.core_type = #tpu.core_type<tc>, window_params = [{transform_indices = @transform_0, window_bounds = array<i64: 8, 32>}, {transform_indices = @transform_1, window_bounds = array<i64: 8, 32>}, {transform_indices = @transform_2, window_bounds = array<i64: 8, 32>}, {transform_indices = @transform_3, window_bounds = array<i64: 1, 8, 128>}]} {
    %c0 = arith.constant 0 : index
    %c0_0 = arith.constant 0 : index
    %0 = vector.load %arg1[%c0, %c0_0] : memref<8x32xbf16, #tpu.memory_space<vmem>>, vector<8x32xbf16>
    %1 = arith.extf %0 : vector<8x32xbf16> to vector<8x32xf32>
    %c0_1 = arith.constant 0 : index
    %c0_2 = arith.constant 0 : index
    %2 = vector.load %arg2[%c0_1, %c0_2] : memref<8x32xbf16, #tpu.memory_space<vmem>>, vector<8x32xbf16>
    %3 = arith.extf %2 : vector<8x32xbf16> to vector<8x32xf32>
    %4 = arith.mulf %1, %3 : vector<8x32xf32>
    %cst = arith.constant dense<0.000000e+00> : vector<8xf32>
    %5 = vector.multi_reduction <add>, %4, %cst [1] : vector<8x32xf32> to vector<8xf32>
    %6 = vector.shape_cast %5 : vector<8xf32> to vector<8x1xf32>
    %c0_3 = arith.constant 0 : index
    %c0_4 = arith.constant 0 : index
    %7 = vector.load %arg3[%c0_3, %c0_4] : memref<8x32xbf16, #tpu.memory_space<vmem>>, vector<8x32xbf16>
    %8 = arith.extf %7 : vector<8x32xbf16> to vector<8x32xf32>
    %9 = arith.mulf %1, %8 : vector<8x32xf32>
    %cst_5 = arith.constant dense<0.000000e+00> : vector<8xf32>
    %10 = vector.multi_reduction <add>, %9, %cst_5 [1] : vector<8x32xf32> to vector<8xf32>
    %11 = vector.shape_cast %10 : vector<8xf32> to vector<8x1xf32>
    %12 = arith.subf %11, %6 : vector<8x1xf32>
    %cst_6 = arith.constant 5.000000e+00 : f32
    %13 = vector.broadcast %cst_6 : f32 to vector<8x1xf32>
    %14 = arith.mulf %12, %13 : vector<8x1xf32>
    %cst_7 = arith.constant 0.000000e+00 : f32
    %15 = vector.broadcast %cst_7 : f32 to vector<8x1xf32>
    %16 = arith.maximumf %14, %15 : vector<8x1xf32>
    %17 = math.absf %14 : vector<8x1xf32>
    %cst_8 = arith.constant 0.000000e+00 : f32
    %18 = vector.broadcast %cst_8 : f32 to vector<8x1xf32>
    %19 = arith.subf %18, %17 : vector<8x1xf32>
    %20 = math.exp %19 : vector<8x1xf32>
    %cst_9 = arith.constant 1.000000e+00 : f32
    %21 = vector.broadcast %cst_9 : f32 to vector<8x1xf32>
    %22 = arith.addf %21, %20 : vector<8x1xf32>
    %23 = math.log %22 : vector<8x1xf32>
    %24 = arith.addf %16, %23 : vector<8x1xf32>
    %c8_i32 = arith.constant 8 : i32
    %25 = arith.muli %arg0, %c8_i32 : i32
    %26 = tpu.iota {dimensions = array<i32: 0>} : vector<8x1xi32>
    %27 = vector.broadcast %25 : i32 to vector<8x1xi32>
    %28 = arith.addi %26, %27 : vector<8x1xi32>
    %c8_i32_10 = arith.constant 8 : i32
    %29 = vector.broadcast %c8_i32_10 : i32 to vector<8x1xi32>
    %30 = arith.cmpi slt, %28, %29 : vector<8x1xi32>
    %cst_11 = arith.constant 0.000000e+00 : f32
    %31 = vector.broadcast %cst_11 : f32 to vector<8x1xf32>
    %32 = arith.select %30, %24, %31 : vector<8x1xi1>, vector<8x1xf32>
    %33 = vector.shape_cast %32 : vector<8x1xf32> to vector<1x8x1xf32>
    %cst_12 = arith.constant dense<0.000000e+00> : vector<1xf32>
    %34 = vector.multi_reduction <add>, %33, %cst_12 [1, 2] : vector<1x8x1xf32> to vector<1xf32>
    %35 = vector.shape_cast %34 : vector<1xf32> to vector<1x1x1xf32>
    %36 = vector.extract %35[0, 0, 0] : f32 from vector<1x1x1xf32>
    %37 = vector.broadcast %36 : f32 to vector<1x8x128xf32>
    %c0_13 = arith.constant 0 : index
    %c0_14 = arith.constant 0 : index
    %c0_15 = arith.constant 0 : index
    %38 = vector.load %arg4[%c0_13, %c0_14, %c0_15] : memref<1x8x128xf32, #tpu.memory_space<vmem>>, vector<1x8x128xf32>
    tpu.vector_store %arg4[%c0_13, %c0_14, %c0_15], %37 {strides = array<i32>} : memref<1x8x128xf32, #tpu.memory_space<vmem>>, vector<1x8x128xf32>,
    return
  }
  func.func @transform_0(%arg0: i32) -> (i32, i32) {
    %c0_i32 = arith.constant 0 : i32
    %c0_i32_0 = arith.constant 0 : i32
    return %arg0, %c0_i32 : i32, i32
  }
  func.func @transform_1(%arg0: i32) -> (i32, i32) {
    %c0_i32 = arith.constant 0 : i32
    %c0_i32_0 = arith.constant 0 : i32
    return %arg0, %c0_i32 : i32, i32
  }
  func.func @transform_2(%arg0: i32) -> (i32, i32) {
    %c0_i32 = arith.constant 0 : i32
    %c0_i32_0 = arith.constant 0 : i32
    return %arg0, %c0_i32 : i32, i32
  }
  func.func @transform_3(%arg0: i32) -> (i32, i32, i32) {
    %c0_i32 = arith.constant 0 : i32
    %c0_i32_0 = arith.constant 0 : i32
    %c0_i32_1 = arith.constant 0 : i32
    return %arg0, %c0_i32, %c0_i32_0 : i32, i32, i32
  }
}

</mosaic_0001>

<bundles_post_ra>
// kernel: tpu_custom_call.1
= control target key start
LH: loop header
LB: loop body
LE: loop exit
PB: predicated region body
PF: predicated region fallthrough
CT: control target
= control target key end

     0   :  { %8 = vsyncpa [#allocation3], 0  ;;  %s244_s0 = inlined_call_operand.hbm [shape: bf16[8,32], index: 0, kind: input, shape index: {}]   ;;  %s245_s1 = inlined_call_operand.hbm [shape: bf16[8,32], index: 1, kind: input, shape index: {}]   ;;  %s246_s2 = inlined_call_operand.vmem [shape: bf16[8,32], index: 2, kind: input, shape index: {}]   ;;  %s247_s3 = inlined_call_operand.hbm [shape: f32[1,8,128], index: 3, kind: output, shape index: {}]  }
   0x1   :  { %9 = vsyncpa [#allocation6], 0 }
   0x2   :  { %10 = vsyncpa [#allocation4], 0  ;;  %s182_s12 = smov [#allocation2]   ;;  %s183_s14 = smov [#allocation5]  }
   0x3   :  { %s17_s13 = sshll.u32 %s182_s12, 4  ;;  %s27_s15 = sshll.u32 %s183_s14, 4  ;;  %s18_s13 = int_to_ptr.vmem [resolvable:$true] %s17_s13  ;;  %s28_s15 = int_to_ptr.vmem [resolvable:$true] %s27_s15 }
   0x4   :  { %s110_s18 = scalar_lea.hbm %s244_s0, 64 }
   0x5   :  { %p111_p0 = scmp.ne.s32.totalorder %s244_s0, %s110_s18  ;;  %p114_p1 = scmp.lt.u32.totalorder %s110_s18, %s244_s0 }
   0x7   :  { %p116_p2 = pnand %p114_p1, %p111_p0 }
   0x9   :  { %119 = shalt.err (!%p116_p2)
}
   0xa   :  { %s120_s23 = scalar_lea.vmem %s18_s13, 64  ;;  %p125_p4 = scmp.lt.s32.totalorder %s18_s13, %s18_s13 }
   0xb   :  { %p121_p3 = scmp.ne.s32.totalorder %s18_s13, %s120_s23  ;;  %p126_p5 = scmp.lt.s32.totalorder %s120_s23, %s120_s23 }
   0xd   :  { %p127_p6 = por %p126_p5, %p125_p4 }
   0xf   :  { %p128_p7 = pnand %p127_p6, %p121_p3 }
  0x11   :  { %131 = shalt.err (!%p128_p7)
}
  0x12   :  { %20 = dma.hbm_to_vmem [thread:$0]  %s244_s0, 64, %s18_s13, [#allocation3]  }
  0x13   :  { %s132_s28 = scalar_lea.hbm %s245_s1, 64 }
  0x14   :  { %p133_p8 = scmp.ne.s32.totalorder %s245_s1, %s132_s28  ;;  %p136_p9 = scmp.lt.u32.totalorder %s132_s28, %s245_s1 }
  0x16   :  { %p138_p10 = pnand %p136_p9, %p133_p8 }
  0x18   :  { %141 = shalt.err (!%p138_p10)
}
  0x19   :  { %s142_s6 = scalar_lea.vmem %s28_s15, 64  ;;  %p147_p12 = scmp.lt.s32.totalorder %s28_s15, %s28_s15 }
  0x1a   :  { %p143_p11 = scmp.ne.s32.totalorder %s28_s15, %s142_s6  ;;  %p148_p13 = scmp.lt.s32.totalorder %s142_s6, %s142_s6 }
  0x1c   :  { %p149_p0 = por %p148_p13, %p147_p12 }
  0x1e   :  { %p150_p1 = pnand %p149_p0, %p143_p11 }
  0x20   :  { %153 = shalt.err (!%p150_p1)
}
  0x21   :  { %30 = dma.hbm_to_vmem [thread:$0]  %s245_s1, 64, %s28_s15, [#allocation6]  }
  0x22   :  { %176 = dma.done.wait [#allocation3], 64  }
  0x23   :  { %177 = vsyncadd [#allocation3], 4294967232 }
  0x24   :  { %178 = dma.done.wait [#allocation6], 64  }
  0x25   :  { %179 = vsyncadd [#allocation6], 4294967232  ;;  %v39_v0 = vld [vmem:[#allocation2] sm:$0xf]  ;;  %v41_v1 = vld [vmem:[#allocation5] sm:$0xf] }
  0x26   :  { %v48_v2 = vld [vmem:[%s246_s2] sm:$0xf]  ;;  %v40_v3 = vunpack.c.l.bf16 %v39_v0  ;;  %v42_v4 = vunpack.c.l.bf16 %v41_v1  ;;  %vm44_vm0 = vcmask 261120   ;;  %vm72_vm1 = vcmask 7168   ;;  %s184_s1 = smov [#allocation7]  }
  0x27   :  { %v49_v5 = vunpack.c.l.bf16 %v48_v2  ;;  %s91_s2 = sshll.u32 %s184_s1, 4  ;;  %s92_s2 = int_to_ptr.vmem [resolvable:$true] %s91_s2 }
  0x28   :  { %v43_v6 = vmul.f32 %v42_v4, %v40_v3  ;;  %s154_s11 = scalar_lea.vmem %s92_s2, 128  ;;  %p159_p3 = scmp.lt.s32.totalorder %s92_s2, %s92_s2 }
  0x29   :  { %v50_v7 = vmul.f32 %v49_v5, %v40_v3  ;;  %p155_p2 = scmp.ne.s32.totalorder %s92_s2, %s154_s11  ;;  %p160_p4 = scmp.lt.s32.totalorder %s154_s11, %s154_s11 }
  0x2a   :  { %v45_v8 = vsel %vm44_vm0, %v43_v6, 0.0 }
  0x2b   :  { %46 = vadd.xlane.f32.xlu0 %v45_v8  ;;  %v51_v9 = vsel %vm44_vm0, %v50_v7, 0.0  ;;  %p161_p5 = por %p160_p4, %p159_p3 }
  0x2d   :  { %p162_p6 = pnand %p161_p5, %p155_p2 }
  0x2f   :  { %52 = vadd.xlane.f32.xlu0 %v51_v9 }
  0xb8   :  { %v47_v10 = vpop.xlane.xlu0 %46 }
  0xbc   :  { %v53_v11 = vpop.xlane.xlu0 %52 }
  0xbd   :  { %v54_v12 = vsub.f32 %v53_v11, %v47_v10 }
  0xbf   :  { %v55_v13 = vmul.f32 5.0, %v54_v12 }
  0xc1   :  { %v57_v14 = vand.u32 2147483647, %v55_v13  ;;  %v56_v20 = vmax.f32 %v55_v13, 0.0 }
  0xc3   :  { %v58_v15 = vsub.f32 0.0, %v57_v14 }
  0xc5   :  { %v59_v16 = vmul.f32 1.442695, %v58_v15 }
  0xc7   :  { %106 = vpow2.f32 %v59_v16 }
  0xd1   :  { %v107_v17 = vpop.eup %106 }
  0xd2   :  { %v61_v18 = vadd.f32 1.0, %v107_v17 }
  0xd4   :  { %108 = vlog2.f32 %v61_v18 }
  0xde   :  { %v109_v19 = vpop.eup %108 }
  0xdf   :  { %v63_v21 = vmul.f32 0.6931472, %v109_v19 }
  0xe1   :  { %v64_v22 = vadd.f32 %v63_v21, %v56_v20 }
  0xe3   :  { %v73_v23 = vsel %vm72_vm1, %v64_v22, 0.0 }
  0xe4   :  { %74 = vadd.xlane.f32.xlu1 %v73_v23 }
 0x171   :  { %v75_v24 = vpop.xlane.xlu1 %74 }
 0x172   :  { %v76_v25 = vrot.slane %v75_v24, 4 }
 0x174   :  { %v77_v26 = vadd.f32 %v76_v25, %v75_v24 }
 0x176   :  { %v78_v27 = vrot.slane %v77_v26, 2 }
 0x178   :  { %v79_v28 = vadd.f32 %v78_v27, %v77_v26 }
 0x17a   :  { %v80_v29 = vrot.slane %v79_v28, 1 }
 0x17c   :  { %v81_v30 = vadd.f32 %v80_v29, %v79_v28 }
 0x17e   :  { %101 = vpush %v81_v30 }
 0x1af   :  { %s102_s10 = spop %101 }
 0x1b0   :  { %v83_v31 = vstv %s102_s10 }
 0x1b1   :  { %84 = vst [vmem:[#allocation7] sm:$0xff] %v83_v31 }
 0x1b2   :  { %165 = shalt.err (!%p162_p6)
}
 0x1b3   :  { %s166_s14 = scalar_lea.hbm %s247_s3, 128 }
 0x1b4   :  { %p167_p7 = scmp.ne.s32.totalorder %s247_s3, %s166_s14  ;;  %p170_p8 = scmp.lt.u32.totalorder %s166_s14, %s247_s3 }
 0x1b6   :  { %p172_p9 = pnand %p170_p8, %p167_p7 }
 0x1b8   :  { %175 = shalt.err (!%p172_p9)
}
 0x1b9   :  { %94 = dma.vmem_to_hbm [thread:$0]  %s92_s2, 128, %s247_s3, [#allocation4]  }
 0x1ba   :  { %180 = dma.done.wait [#allocation4], 128  }
 0x1bb   :  { %181 = vsyncadd [#allocation4], 4294967168 }
 0x1bc   :  { %98 = vsyncpa [#allocation3], 1 }
 0x1bd   :  { %99 = vsyncpa [#allocation6], 1 }
 0x1be   :  { %100 = vsyncpa [#allocation4], 1 }

</bundles_post_ra>
